<compile_context>
chip_gen: v7x
topology: tpu7x:2x2x1
jax: 0.10.0
libtpu: 0.0.40
codegen_flags: <defaults>
</compile_context>

<pallas_src>
import functools

import jax
import jax.numpy as jnp
import numpy as np
from jax.experimental import pallas as pl
from jax.experimental.pallas import tpu as pltpu

P_DROP = 0.3
KEEP_PROB = 1.0 - P_DROP
INV_KEEP = 1.0 / KEEP_PROB
EPS = 1e-5
LANE = 128

# keep element iff random bits < threshold
KEEP_THRESHOLD_U8 = int(round(KEEP_PROB * 256))                        # 179 -> p_keep = 179/256
KEEP_THRESHOLD_U32 = np.uint32(int(round(KEEP_PROB * 2 ** 32)) & 0xFFFFFFFF)

# In-kernel PRNG removes two activation-sized HBM streams (review item #1) but
# pltpu.prng_* does not lower under interpret / CPU fallback, so default off.
USE_IN_KERNEL_PRNG = False


def _round_up(n, m):
    return ((n + m - 1) // m) * m


def residual_block_kernel(seed_ref, x_ref, w1_ref, g1_ref, bt1_ref,
                          w2_ref, g2_ref, bt2_ref, *rest, use_prng):
    if use_prng:
        (o_ref,) = rest
        bits1_ref = bits2_ref = None
    else:
        bits1_ref, bits2_ref, o_ref = rest

    x = x_ref[...]                      # f32 (B, in_p); also the residual identity
    inv_n = 1.0 / x.shape[0]            # true batch size (no batch padding)

    if use_prng:
        pltpu.prng_seed(seed_ref[0])

    def keep_mask(shape, bits_ref):
        if use_prng:
            bits = pltpu.prng_random_bits(shape)
            if bits.dtype != jnp.uint32:
                bits = pltpu.bitcast(bits, jnp.uint32)
            return bits < KEEP_THRESHOLD_U32          # numpy scalar -> jaxpr literal
        # uint8 bits: widen in-register, compare against a Python int literal.
        return bits_ref[...].astype(jnp.int32) < KEEP_THRESHOLD_U8

    def bn_relu_dropout(h, gamma, beta, keep):
        # training-mode BatchNorm1d statistics; two-pass (centered) variance.
        mean = jnp.sum(h, axis=0, keepdims=True) * inv_n
        d = h - mean
        var = jnp.sum(d * d, axis=0, keepdims=True) * inv_n
        r = jax.lax.rsqrt(var + EPS)
        # Fold BN affine and 1/keep_prob into one per-feature scale/shift.
        # Padded lanes have gamma == beta == 0 -> scale == shift == 0, so padded
        # features stay exactly 0 through ReLU / dropout / the next matmul.
        scale = gamma * r * INV_KEEP
        shift = (beta - mean * gamma * r) * INV_KEEP
        a = jnp.maximum(h * scale + shift, 0.0)
        return jnp.where(keep, a, 0.0)

    # fc1 (bias cancelled by training-mode BN) -> BN1 -> ReLU -> Dropout
    h = jnp.dot(x.astype(jnp.bfloat16), w1_ref[...],
                preferred_element_type=jnp.float32)
    h = bn_relu_dropout(h, g1_ref[...], bt1_ref[...], keep_mask(h.shape, bits1_ref))

    # fc2 (bias cancelled) -> BN2 -> ReLU -> Dropout
    h = jnp.dot(h.astype(jnp.bfloat16), w2_ref[...],
                preferred_element_type=jnp.float32)
    h = bn_relu_dropout(h, g2_ref[...], bt2_ref[...], keep_mask(h.shape, bits2_ref))

    o_ref[...] = (h + x).astype(o_ref.dtype)


def prepare_params(w1, b1, g1, bt1, w2, b2, g2, bt2):
    """One-time lane padding (multiples of 128) + bf16 weight cast.

    Linear biases are dropped: a bias immediately followed by training-mode
    BatchNorm cancels exactly in the mean subtraction.  Padded gamma AND beta
    columns must remain exactly 0 so padded feature lanes stay 0.
    """
    del b1, b2
    in_dim, hidden = w1.shape
    in_p = _round_up(max(in_dim, LANE), LANE)
    hid_p = _round_up(max(hidden, LANE), LANE)
    dpi, dph = in_p - in_dim, hid_p - hidden
    w1_p = jnp.pad(w1, ((0, dpi), (0, dph))).astype(jnp.bfloat16)
    w2_p = jnp.pad(w2, ((0, dph), (0, dpi))).astype(jnp.bfloat16)
    g1_p = jnp.pad(g1, (0, dph)).reshape(1, hid_p)
    bt1_p = jnp.pad(bt1, (0, dph)).reshape(1, hid_p)
    g2_p = jnp.pad(g2, (0, dpi)).reshape(1, in_p)
    bt2_p = jnp.pad(bt2, (0, dpi)).reshape(1, in_p)
    return w1_p, g1_p, bt1_p, w2_p, g2_p, bt2_p


@jax.jit
def residual_block(x, padded_params, key):
    w1_p, g1_p, bt1_p, w2_p, g2_p, bt2_p = padded_params
    B, in_dim = x.shape
    in_p, hid_p = w1_p.shape

    x_p = jnp.pad(x, ((0, 0), (0, in_p - in_dim)))

    kseed, k1, k2 = jax.random.split(key, 3)
    seed = jax.random.randint(kseed, (1,), 0, jnp.iinfo(jnp.int32).max,
                              dtype=jnp.int32)

    def spec(shape):
        return pl.BlockSpec(shape, lambda i, *_: (0,) * len(shape))

    in_specs = [
        spec((B, in_p)),       # x   (padded, f32)
        spec((in_p, hid_p)),   # w1  (bf16)
        spec((1, hid_p)),      # gamma1
        spec((1, hid_p)),      # beta1
        spec((hid_p, in_p)),   # w2  (bf16)
        spec((1, in_p)),       # gamma2
        spec((1, in_p)),       # beta2
    ]
    extra_inputs = ()
    if not USE_IN_KERNEL_PRNG:
        bits1 = jax.random.bits(k1, (B, hid_p), dtype=jnp.uint8)
        bits2 = jax.random.bits(k2, (B, in_p), dtype=jnp.uint8)
        in_specs += [spec((B, hid_p)), spec((B, in_p))]
        extra_inputs = (bits1, bits2)

    # VMEM budget: ~2x actual footprint, capped at 48 MiB (v7x headroom).
    est = (2 * B * in_p * 4                 # x + out (f32)
           + 2 * in_p * hid_p * 2           # bf16 weights
           + 2 * (hid_p + in_p) * 4         # gamma/beta rows
           + B * (hid_p + in_p)             # u8 dropout bits
           + 2 * B * max(hid_p, in_p) * 4)  # live f32 intermediates
    vmem_limit = int(max(8 << 20, min(2 * est, 48 << 20)))

    grid_spec = pltpu.PrefetchScalarGridSpec(
        num_scalar_prefetch=1,
        grid=(1,),
        in_specs=in_specs,
        out_specs=spec((B, in_p)),
        scratch_shapes=[],
    )

    out_p = pl.pallas_call(
        functools.partial(residual_block_kernel, use_prng=USE_IN_KERNEL_PRNG),
        out_shape=jax.ShapeDtypeStruct((B, in_p), x.dtype),
        grid_spec=grid_spec,
        compiler_params=pltpu.CompilerParams(
            dimension_semantics=("arbitrary",),
            vmem_limit_bytes=vmem_limit,
        ),
    )(seed, x_p, w1_p, g1_p, bt1_p, w2_p, g2_p, bt2_p, *extra_inputs)

    return out_p[:, :in_dim]


def init_params(key, in_dim, hidden):
    """PyTorch-style init: Linear ~ U(-1/sqrt(fan_in), +...), BN gamma=1 beta=0."""
    k1, k2, k3, k4 = jax.random.split(key, 4)
    bound1 = 1.0 / jnp.sqrt(in_dim)
    bound2 = 1.0 / jnp.sqrt(hidden)
    # weights stored pre-transposed: (in_features, out_features)
    w1 = jax.random.uniform(k1, (in_dim, hidden), jnp.float32, -bound1, bound1)
    b1 = jax.random.uniform(k2, (hidden,), jnp.float32, -bound1, bound1)
    w2 = jax.random.uniform(k3, (hidden, in_dim), jnp.float32, -bound2, bound2)
    b2 = jax.random.uniform(k4, (in_dim,), jnp.float32, -bound2, bound2)
    g1 = jnp.ones((hidden,), jnp.float32)
    bt1 = jnp.zeros((hidden,), jnp.float32)
    g2 = jnp.ones((in_dim,), jnp.float32)
    bt2 = jnp.zeros((in_dim,), jnp.float32)
    return w1, b1, g1, bt1, w2, b2, g2, bt2


if __name__ == "__main__":
    B, IN_DIM, HIDDEN = 8, 32, 64

    key = jax.random.PRNGKey(0)
    kx, kp, kd = jax.random.split(key, 3)
    x = jax.random.normal(kx, (B, IN_DIM), dtype=jnp.float32)
    raw_params = init_params(kp, IN_DIM, HIDDEN)
    padded_params = prepare_params(*raw_params)   # one-time pad + bf16 cast

    out = residual_block(x, padded_params, kd)
    out = jax.block_until_ready(out)

    assert out.shape == (B, IN_DIM), out.shape
    assert bool(jnp.all(jnp.isfinite(out)))
    print("KERNEL_OK")
</pallas_src>

<mosaic_0001>
module attributes {stable_mosaic.version = 11 : i64} {
  func.func @residual_block_kernel(%arg0: i32, %arg1: memref<1xi32, #tpu.memory_space<smem>>, %arg2: memref<8x128xf32, #tpu.memory_space<vmem>>, %arg3: memref<128x128xbf16, #tpu.memory_space<vmem>>, %arg4: memref<1x128xf32, #tpu.memory_space<vmem>>, %arg5: memref<1x128xf32, #tpu.memory_space<vmem>>, %arg6: memref<128x128xbf16, #tpu.memory_space<vmem>>, %arg7: memref<1x128xf32, #tpu.memory_space<vmem>>, %arg8: memref<1x128xf32, #tpu.memory_space<vmem>>, %arg9: memref<8x128xi8, #tpu.memory_space<vmem>>, %arg10: memref<8x128xi8, #tpu.memory_space<vmem>>, %arg11: memref<8x128xf32, #tpu.memory_space<vmem>>) attributes {dimension_semantics = [#tpu.dimension_semantics<arbitrary>], iteration_bounds = array<i64: 1>, scalar_prefetch = 1 : i64, scratch_operands = 0 : i64, tpu.core_type = #tpu.core_type<tc>, window_params = [{pipeline_mode = #tpu.pipeline_mode<synchronous>, transform_indices = @transform_0, window_bounds = array<i64: 8, 128>}, {pipeline_mode = #tpu.pipeline_mode<synchronous>, transform_indices = @transform_1, window_bounds = array<i64: 128, 128>}, {pipeline_mode = #tpu.pipeline_mode<synchronous>, transform_indices = @transform_2, window_bounds = array<i64: 1, 128>}, {pipeline_mode = #tpu.pipeline_mode<synchronous>, transform_indices = @transform_3, window_bounds = array<i64: 1, 128>}, {pipeline_mode = #tpu.pipeline_mode<synchronous>, transform_indices = @transform_4, window_bounds = array<i64: 128, 128>}, {pipeline_mode = #tpu.pipeline_mode<synchronous>, transform_indices = @transform_5, window_bounds = array<i64: 1, 128>}, {pipeline_mode = #tpu.pipeline_mode<synchronous>, transform_indices = @transform_6, window_bounds = array<i64: 1, 128>}, {pipeline_mode = #tpu.pipeline_mode<synchronous>, transform_indices = @transform_7, window_bounds = array<i64: 8, 128>}, {pipeline_mode = #tpu.pipeline_mode<synchronous>, transform_indices = @transform_8, window_bounds = array<i64: 8, 128>}, {pipeline_mode = #tpu.pipeline_mode<synchronous>, transform_indices = @transform_9, window_bounds = array<i64: 8, 128>}]} {
    %c0 = arith.constant 0 : index
    %c0_0 = arith.constant 0 : index
    %0 = vector.load %arg2[%c0, %c0_0] : memref<8x128xf32, #tpu.memory_space<vmem>>, vector<8x128xf32>
    %1 = arith.truncf %0 : vector<8x128xf32> to vector<8x128xbf16>
    %c0_1 = arith.constant 0 : index
    %c0_2 = arith.constant 0 : index
    %2 = vector.load %arg3[%c0_1, %c0_2] : memref<128x128xbf16, #tpu.memory_space<vmem>>, vector<128x128xbf16>
    %cst = arith.constant dense<0.000000e+00> : vector<8x128xf32>
    %3 = tpu.matmul %1, %2, %cst {dimension_numbers = #tpu.dot_dimension_numbers<[1], [0], [0], [1], [0, 0, 1, 1], [], []>} : vector<8x128xbf16>, vector<128x128xbf16>, vector<8x128xf32> -> vector<8x128xf32>
    %c0_3 = arith.constant 0 : index
    %c0_4 = arith.constant 0 : index
    %4 = vector.load %arg4[%c0_3, %c0_4] : memref<1x128xf32, #tpu.memory_space<vmem>>, vector<1x128xf32>
    %c0_5 = arith.constant 0 : index
    %c0_6 = arith.constant 0 : index
    %5 = vector.load %arg5[%c0_5, %c0_6] : memref<1x128xf32, #tpu.memory_space<vmem>>, vector<1x128xf32>
    %c0_7 = arith.constant 0 : index
    %c0_8 = arith.constant 0 : index
    %6 = vector.load %arg9[%c0_7, %c0_8] : memref<8x128xi8, #tpu.memory_space<vmem>>, vector<8x128xi8>
    %7 = arith.extui %6 : vector<8x128xi8> to vector<8x128xi32>
    %c179_i32 = arith.constant 179 : i32
    %8 = vector.broadcast %c179_i32 : i32 to vector<8x128xi32>
    %9 = arith.cmpi slt, %7, %8 : vector<8x128xi32>
    %cst_9 = arith.constant dense<0.000000e+00> : vector<128xf32>
    %10 = vector.multi_reduction <add>, %3, %cst_9 [0] : vector<8x128xf32> to vector<128xf32>
    %11 = vector.shape_cast %10 : vector<128xf32> to vector<1x128xf32>
    %cst_10 = arith.constant 1.250000e-01 : f32
    %12 = vector.broadcast %cst_10 : f32 to vector<1x128xf32>
    %13 = arith.mulf %11, %12 : vector<1x128xf32>
    %14 = vector.broadcast %13 : vector<1x128xf32> to vector<8x128xf32>
    %15 = arith.subf %3, %14 : vector<8x128xf32>
    %16 = arith.mulf %15, %15 : vector<8x128xf32>
    %cst_11 = arith.constant dense<0.000000e+00> : vector<128xf32>
    %17 = vector.multi_reduction <add>, %16, %cst_11 [0] : vector<8x128xf32> to vector<128xf32>
    %18 = vector.shape_cast %17 : vector<128xf32> to vector<1x128xf32>
    %cst_12 = arith.constant 1.250000e-01 : f32
    %19 = vector.broadcast %cst_12 : f32 to vector<1x128xf32>
    %20 = arith.mulf %18, %19 : vector<1x128xf32>
    %cst_13 = arith.constant 9.99999974E-6 : f32
    %21 = vector.broadcast %cst_13 : f32 to vector<1x128xf32>
    %22 = arith.addf %20, %21 : vector<1x128xf32>
    %23 = math.rsqrt %22 : vector<1x128xf32>
    %24 = arith.mulf %4, %23 : vector<1x128xf32>
    %cst_14 = arith.constant 1.42857146 : f32
    %25 = vector.broadcast %cst_14 : f32 to vector<1x128xf32>
    %26 = arith.mulf %24, %25 : vector<1x128xf32>
    %27 = arith.mulf %13, %4 : vector<1x128xf32>
    %28 = arith.mulf %27, %23 : vector<1x128xf32>
    %29 = arith.subf %5, %28 : vector<1x128xf32>
    %cst_15 = arith.constant 1.42857146 : f32
    %30 = vector.broadcast %cst_15 : f32 to vector<1x128xf32>
    %31 = arith.mulf %29, %30 : vector<1x128xf32>
    %32 = vector.broadcast %26 : vector<1x128xf32> to vector<8x128xf32>
    %33 = arith.mulf %3, %32 : vector<8x128xf32>
    %34 = vector.broadcast %31 : vector<1x128xf32> to vector<8x128xf32>
    %35 = arith.addf %33, %34 : vector<8x128xf32>
    %cst_16 = arith.constant 0.000000e+00 : f32
    %36 = vector.broadcast %cst_16 : f32 to vector<8x128xf32>
    %37 = arith.maximumf %35, %36 : vector<8x128xf32>
    %cst_17 = arith.constant 0.000000e+00 : f32
    %38 = vector.broadcast %cst_17 : f32 to vector<8x128xf32>
    %39 = arith.select %9, %37, %38 : vector<8x128xi1>, vector<8x128xf32>
    %40 = arith.truncf %39 : vector<8x128xf32> to vector<8x128xbf16>
    %c0_18 = arith.constant 0 : index
    %c0_19 = arith.constant 0 : index
    %41 = vector.load %arg6[%c0_18, %c0_19] : memref<128x128xbf16, #tpu.memory_space<vmem>>, vector<128x128xbf16>
    %cst_20 = arith.constant dense<0.000000e+00> : vector<8x128xf32>
    %42 = tpu.matmul %40, %41, %cst_20 {dimension_numbers = #tpu.dot_dimension_numbers<[1], [0], [0], [1], [0, 0, 1, 1], [], []>} : vector<8x128xbf16>, vector<128x128xbf16>, vector<8x128xf32> -> vector<8x128xf32>
    %c0_21 = arith.constant 0 : index
    %c0_22 = arith.constant 0 : index
    %43 = vector.load %arg7[%c0_21, %c0_22] : memref<1x128xf32, #tpu.memory_space<vmem>>, vector<1x128xf32>
    %c0_23 = arith.constant 0 : index
    %c0_24 = arith.constant 0 : index
    %44 = vector.load %arg8[%c0_23, %c0_24] : memref<1x128xf32, #tpu.memory_space<vmem>>, vector<1x128xf32>
    %c0_25 = arith.constant 0 : index
    %c0_26 = arith.constant 0 : index
    %45 = vector.load %arg10[%c0_25, %c0_26] : memref<8x128xi8, #tpu.memory_space<vmem>>, vector<8x128xi8>
    %46 = arith.extui %45 : vector<8x128xi8> to vector<8x128xi32>
    %c179_i32_27 = arith.constant 179 : i32
    %47 = vector.broadcast %c179_i32_27 : i32 to vector<8x128xi32>
    %48 = arith.cmpi slt, %46, %47 : vector<8x128xi32>
    %cst_28 = arith.constant dense<0.000000e+00> : vector<128xf32>
    %49 = vector.multi_reduction <add>, %42, %cst_28 [0] : vector<8x128xf32> to vector<128xf32>
    %50 = vector.shape_cast %49 : vector<128xf32> to vector<1x128xf32>
    %cst_29 = arith.constant 1.250000e-01 : f32
    %51 = vector.broadcast %cst_29 : f32 to vector<1x128xf32>
    %52 = arith.mulf %50, %51 : vector<1x128xf32>
    %53 = vector.broadcast %52 : vector<1x128xf32> to vector<8x128xf32>
    %54 = arith.subf %42, %53 : vector<8x128xf32>
    %55 = arith.mulf %54, %54 : vector<8x128xf32>
    %cst_30 = arith.constant dense<0.000000e+00> : vector<128xf32>
    %56 = vector.multi_reduction <add>, %55, %cst_30 [0] : vector<8x128xf32> to vector<128xf32>
    %57 = vector.shape_cast %56 : vector<128xf32> to vector<1x128xf32>
    %cst_31 = arith.constant 1.250000e-01 : f32
    %58 = vector.broadcast %cst_31 : f32 to vector<1x128xf32>
    %59 = arith.mulf %57, %58 : vector<1x128xf32>
    %cst_32 = arith.constant 9.99999974E-6 : f32
    %60 = vector.broadcast %cst_32 : f32 to vector<1x128xf32>
    %61 = arith.addf %59, %60 : vector<1x128xf32>
    %62 = math.rsqrt %61 : vector<1x128xf32>
    %63 = arith.mulf %43, %62 : vector<1x128xf32>
    %cst_33 = arith.constant 1.42857146 : f32
    %64 = vector.broadcast %cst_33 : f32 to vector<1x128xf32>
    %65 = arith.mulf %63, %64 : vector<1x128xf32>
    %66 = arith.mulf %52, %43 : vector<1x128xf32>
    %67 = arith.mulf %66, %62 : vector<1x128xf32>
    %68 = arith.subf %44, %67 : vector<1x128xf32>
    %cst_34 = arith.constant 1.42857146 : f32
    %69 = vector.broadcast %cst_34 : f32 to vector<1x128xf32>
    %70 = arith.mulf %68, %69 : vector<1x128xf32>
    %71 = vector.broadcast %65 : vector<1x128xf32> to vector<8x128xf32>
    %72 = arith.mulf %42, %71 : vector<8x128xf32>
    %73 = vector.broadcast %70 : vector<1x128xf32> to vector<8x128xf32>
    %74 = arith.addf %72, %73 : vector<8x128xf32>
    %cst_35 = arith.constant 0.000000e+00 : f32
    %75 = vector.broadcast %cst_35 : f32 to vector<8x128xf32>
    %76 = arith.maximumf %74, %75 : vector<8x128xf32>
    %cst_36 = arith.constant 0.000000e+00 : f32
    %77 = vector.broadcast %cst_36 : f32 to vector<8x128xf32>
    %78 = arith.select %48, %76, %77 : vector<8x128xi1>, vector<8x128xf32>
    %79 = arith.addf %78, %0 : vector<8x128xf32>
    %c0_37 = arith.constant 0 : index
    %c0_38 = arith.constant 0 : index
    %80 = vector.load %arg11[%c0_37, %c0_38] : memref<8x128xf32, #tpu.memory_space<vmem>>, vector<8x128xf32>
    tpu.vector_store %arg11[%c0_37, %c0_38], %79 {strides = array<i32>} : memref<8x128xf32, #tpu.memory_space<vmem>>, vector<8x128xf32>,
    return
  }
  func.func @transform_0(%arg0: i32, %arg1: memref<1xi32, #tpu.memory_space<smem>>) -> (i32, i32) {
    %c0_i32 = arith.constant 0 : i32
    %c0_i32_0 = arith.constant 0 : i32
    %c0_i32_1 = arith.constant 0 : i32
    return %c0_i32, %c0_i32_0 : i32, i32
  }
  func.func @transform_1(%arg0: i32, %arg1: memref<1xi32, #tpu.memory_space<smem>>) -> (i32, i32) {
    %c0_i32 = arith.constant 0 : i32
    %c0_i32_0 = arith.constant 0 : i32
    %c0_i32_1 = arith.constant 0 : i32
    return %c0_i32, %c0_i32_0 : i32, i32
  }
  func.func @transform_2(%arg0: i32, %arg1: memref<1xi32, #tpu.memory_space<smem>>) -> (i32, i32) {
    %c0_i32 = arith.constant 0 : i32
    %c0_i32_0 = arith.constant 0 : i32
    %c0_i32_1 = arith.constant 0 : i32
    return %c0_i32, %c0_i32_0 : i32, i32
  }
  func.func @transform_3(%arg0: i32, %arg1: memref<1xi32, #tpu.memory_space<smem>>) -> (i32, i32) {
    %c0_i32 = arith.constant 0 : i32
    %c0_i32_0 = arith.constant 0 : i32
    %c0_i32_1 = arith.constant 0 : i32
    return %c0_i32, %c0_i32_0 : i32, i32
  }
  func.func @transform_4(%arg0: i32, %arg1: memref<1xi32, #tpu.memory_space<smem>>) -> (i32, i32) {
    %c0_i32 = arith.constant 0 : i32
    %c0_i32_0 = arith.constant 0 : i32
    %c0_i32_1 = arith.constant 0 : i32
    return %c0_i32, %c0_i32_0 : i32, i32
  }
  func.func @transform_5(%arg0: i32, %arg1: memref<1xi32, #tpu.memory_space<smem>>) -> (i32, i32) {
    %c0_i32 = arith.constant 0 : i32
    %c0_i32_0 = arith.constant 0 : i32
    %c0_i32_1 = arith.constant 0 : i32
    return %c0_i32, %c0_i32_0 : i32, i32
  }
  func.func @transform_6(%arg0: i32, %arg1: memref<1xi32, #tpu.memory_space<smem>>) -> (i32, i32) {
    %c0_i32 = arith.constant 0 : i32
    %c0_i32_0 = arith.constant 0 : i32
    %c0_i32_1 = arith.constant 0 : i32
    return %c0_i32, %c0_i32_0 : i32, i32
  }
  func.func @transform_7(%arg0: i32, %arg1: memref<1xi32, #tpu.memory_space<smem>>) -> (i32, i32) {
    %c0_i32 = arith.constant 0 : i32
    %c0_i32_0 = arith.constant 0 : i32
    %c0_i32_1 = arith.constant 0 : i32
    return %c0_i32, %c0_i32_0 : i32, i32
  }
  func.func @transform_8(%arg0: i32, %arg1: memref<1xi32, #tpu.memory_space<smem>>) -> (i32, i32) {
    %c0_i32 = arith.constant 0 : i32
    %c0_i32_0 = arith.constant 0 : i32
    %c0_i32_1 = arith.constant 0 : i32
    return %c0_i32, %c0_i32_0 : i32, i32
  }
  func.func @transform_9(%arg0: i32, %arg1: memref<1xi32, #tpu.memory_space<smem>>) -> (i32, i32) {
    %c0_i32 = arith.constant 0 : i32
    %c0_i32_0 = arith.constant 0 : i32
    %c0_i32_1 = arith.constant 0 : i32
    return %c0_i32, %c0_i32_0 : i32, i32
  }
}

</mosaic_0001>

<bundles_post_ra>
// kernel: residual_block.7
= control target key start
LH: loop header
LB: loop body
LE: loop exit
PB: predicated region body
PF: predicated region fallthrough
CT: control target
= control target key end

     0   :  { %v479_v1 = vmov 0.0   ;;  %vm480_vm0 = vmmov 0   ;;  %s623_s0 = inlined_call_operand.<no memory space> [shape: s32[1], index: 0, kind: input, shape index: {}]   ;;  %s624_s1 = inlined_call_operand.vmem [shape: f32[8,128], index: 1, kind: input, shape index: {}]   ;;  %s625_s2 = inlined_call_operand.vmem [shape: bf16[128,128], index: 2, kind: input, shape index: {}]   ;;  %s626_s3 = inlined_call_operand.vmem [shape: f32[1,128], index: 3, kind: input, shape index: {}]   ;;  %s627_s4 = inlined_call_operand.vmem [shape: f32[1,128], index: 4, kind: input, shape index: {}]   ;;  %s628_s5 = inlined_call_operand.vmem [shape: bf16[128,128], index: 5, kind: input, shape index: {}]   ;;  %s629_s6 = inlined_call_operand.vmem [shape: f32[1,128], index: 6, kind: input, shape index: {}]   ;;  %s630_s7 = inlined_call_operand.vmem [shape: f32[1,128], index: 7, kind: input, shape index: {}]   ;;  %s631_s8 = inlined_call_operand.vmem [shape: u8[8,128], index: 8, kind: input, shape index: {}]   ;;  %s632_s9 = inlined_call_operand.vmem [shape: u8[8,128], index: 9, kind: input, shape index: {}]   ;;  %s633_s10 = inlined_call_operand.hbm [shape: f32[8,128], index: 10, kind: output, shape index: {}]  }
   0x1   :  { %v435_v0 = vld [vmem:[%s625_s2] sm:$0xff]   ;;  %392 = vmatprep.subr.bf16.mxu0 %v479_v1  ;;  %412 = vmatprep.subr.bf16.mxu1 %v479_v1  ;;  %v436_v2 = vld [vmem:[%s625_s2 + $0x8] sm:$0xff]   ;;  %v437_v3 = vld [vmem:[%s625_s2 + $0x10] sm:$0xff]  }
   0x2   :  { %393 = vmatpush3.bf16.msra.mxu0 %v435_v0  ;;  %408 = vmatprep.mubr.msk.bf16.mxu0 %vm480_vm0, %v479_v1  ;;  %v438_v4 = vld [vmem:[%s625_s2 + $0x18] sm:$0xff]  }
   0x3   :  { %394 = vmatprep.subr.bf16.mxu0 %v479_v1  ;;  %428 = vmatprep.mubr.msk.bf16.mxu1 %vm480_vm0, %v479_v1 }
   0x6   :  { %395 = vmatpush3.bf16.msra.mxu0 %v436_v2 }
   0x7   :  { %396 = vmatprep.subr.bf16.mxu0 %v479_v1 }
   0xa   :  { %397 = vmatpush3.bf16.msra.mxu0 %v437_v3 }
   0xb   :  { %398 = vmatprep.subr.bf16.mxu0 %v479_v1 }
   0xc   :  { %16 = vsyncpa [#allocation5], 0  ;;  %v439_v5 = vld [vmem:[%s625_s2 + $0x20] sm:$0xff]   ;;  %v440_v6 = vld [vmem:[%s625_s2 + $0x28] sm:$0xff]   ;;  %v173_v40 = vlaneseq }
   0xd   :  { %v441_v7 = vld [vmem:[%s625_s2 + $0x30] sm:$0xff]   ;;  %v442_v8 = vld [vmem:[%s625_s2 + $0x38] sm:$0xff]   ;;  %v564_v9 = vld [vmem:[%s624_s1] sm:$0xff] }
   0xe   :  { %399 = vmatpush3.bf16.msra.mxu0 %v438_v4  ;;  %v37_v10 = vpack.c.bf16 %v564_v9, %v564_v9  ;;  %v443_v11 = vld [vmem:[%s628_s5] sm:$0xff]   ;;  %v444_v12 = vld [vmem:[%s628_s5 + $0x8] sm:$0xff]   ;;  %v445_v13 = vld [vmem:[%s628_s5 + $0x10] sm:$0xff]   ;;  %v174_v42 = vshrl.u32 %v173_v40, 7 }
   0xf   :  { %400 = vmatprep.subr.bf16.mxu0 %v479_v1  ;;  %413 = vmatpush3.bf16.msra.mxu1 %v443_v11  ;;  %v446_v14 = vld [vmem:[%s628_s5 + $0x18] sm:$0xff]   ;;  %v447_v15 = vld [vmem:[%s628_s5 + $0x20] sm:$0xff]   ;;  %v448_v16 = vld [vmem:[%s628_s5 + $0x28] sm:$0xff]  }
  0x10   :  { %414 = vmatprep.subr.bf16.mxu1 %v479_v1  ;;  %v449_v17 = vld [vmem:[%s628_s5 + $0x30] sm:$0xff]   ;;  %v450_v18 = vld [vmem:[%s628_s5 + $0x38] sm:$0xff]   ;;  %v142_v41 = vld [vmem:[%s626_s3] sm:$0x1]  ;;  %v175_v49 = vsub.s32 0, %v174_v42 }
  0x11   :  { %v144_v43 = vld [vmem:[%s631_s8] sm:$0x3] }
  0x12   :  { %401 = vmatpush3.bf16.msra.mxu0 %v439_v5  ;;  %v143_v46 = vld [vmem:[%s627_s4] sm:$0x1]  ;;  %v145_v50 = vunpack.c.0.s8 %v144_v43 }
  0x13   :  { %402 = vmatprep.subr.bf16.mxu0 %v479_v1  ;;  %415 = vmatpush3.bf16.msra.mxu1 %v444_v12 }
  0x14   :  { %416 = vmatprep.subr.bf16.mxu1 %v479_v1  ;;  %v146_v55 = vand.u32 255, %v145_v50 }
  0x16   :  { %403 = vmatpush3.bf16.msra.mxu0 %v440_v6  ;;  %vm147_vm1 = vcmp.lt.s32.totalorder %v146_v55, 179 }
  0x17   :  { %404 = vmatprep.subr.bf16.mxu0 %v479_v1  ;;  %417 = vmatpush3.bf16.msra.mxu1 %v445_v13  ;;  %vm371_vm2 = vmpackc.low %vm147_vm1, %vm147_vm1 }
  0x18   :  { %418 = vmatprep.subr.bf16.mxu1 %v479_v1 }
  0x1a   :  { %405 = vmatpush3.bf16.msra.mxu0 %v441_v7 }
  0x1b   :  { %406 = vmatprep.subr.bf16.mxu0 %v479_v1  ;;  %419 = vmatpush3.bf16.msra.mxu1 %v446_v14 }
  0x1c   :  { %420 = vmatprep.subr.bf16.mxu1 %v479_v1 }
  0x1e   :  { %407 = vmatpush3.bf16.msra.mxu0 %v442_v8 }
  0x1f   :  { %421 = vmatpush3.bf16.msra.mxu1 %v447_v15 }
  0x20   :  { %422 = vmatprep.subr.bf16.mxu1 %v479_v1 }
  0x21   :  { %409 = vmatmul.mubr.bf16.vlgmr.msra.gmra.mrb[0].mxu0 %v37_v10 }
  0x23   :  { %423 = vmatpush3.bf16.msra.mxu1 %v448_v16 }
  0x24   :  { %424 = vmatprep.subr.bf16.mxu1 %v479_v1 }
  0x27   :  { %425 = vmatpush3.bf16.msra.mxu1 %v449_v17 }
  0x28   :  { %426 = vmatprep.subr.bf16.mxu1 %v479_v1 }
  0x2b   :  { %427 = vmatpush3.bf16.msra.mxu1 %v450_v18 }
  0xf4   :  { %v136_v19 = vpop.f32.mrb[0].mxu0 }
  0xf5   :  { %v148_v20 = vrot.slane %v136_v19, 4  ;;  %v410_v21 = vpop.f32.mrb[1].mxu0 }
  0xf6   :  { %v139_v22 = vpop.f32.mrb[2].mxu0  ;;  %v295_v21 = vld [vmem:[%s632_s9] sm:$0x3] }
  0xf7   :  { %v149_v23 = vadd.f32 %v148_v20, %v136_v19  ;;  %v411_v24 = vpop.f32.mrb[3].mxu0 }
  0xf9   :  { %v150_v25 = vrot.slane %v149_v23, 2 }
  0xfb   :  { %v151_v26 = vadd.f32 %v150_v25, %v149_v23  ;;  %v294_v23 = vld [vmem:[%s630_s7] sm:$0x1] }
  0xfd   :  { %v152_v27 = vrot.slane %v151_v26, 1 }
  0xff   :  { %v153_v28 = vadd.f32 %v152_v27, %v151_v26  ;;  %v296_v26 = vunpack.c.0.s8 %v295_v21 }
 0x101   :  { %v154_v29 = vmul.f32 0.125, %v153_v28 }
 0x103   :  { %v155_v30 = vsub.f32 %v136_v19, %v154_v29  ;;  %v168_v44 = vmul.f32 %v154_v29, %v142_v41 }
 0x105   :  { %v156_v31 = vmul.f32 %v155_v30, %v155_v30 }
 0x107   :  { %v157_v32 = vrot.slane %v156_v31, 4 }
 0x109   :  { %v158_v33 = vadd.f32 %v157_v32, %v156_v31  ;;  %v297_v31 = vand.u32 255, %v296_v26 }
 0x10b   :  { %v159_v34 = vrot.slane %v158_v33, 2  ;;  %vm298_vm3 = vcmp.lt.s32.totalorder %v297_v31, 179 }
 0x10d   :  { %v160_v35 = vadd.f32 %v159_v34, %v158_v33 }
 0x10f   :  { %v161_v36 = vrot.slane %v160_v35, 1 }
 0x111   :  { %v162_v37 = vadd.f32 %v161_v36, %v160_v35 }
 0x113   :  { %v163_v38 = vmul.f32 0.125, %v162_v37 }
 0x115   :  { %v164_v39 = vadd.f32 1e-05, %v163_v38 }
 0x117   :  { %451 = vrsqrt.f32 %v164_v39 }
 0x121   :  { %v452_v45 = vpop.eup %451 }
 0x122   :  { %v166_v47 = vmul.f32 %v452_v45, %v142_v41  ;;  %v169_v48 = vmul.f32 %v452_v45, %v168_v44 }
 0x124   :  { %v167_v51 = vmul.f32 1.4285715, %v166_v47  ;;  %v170_v52 = vsub.f32 %v143_v46, %v169_v48 }
 0x126   :  { %v171_v53 = vmul.f32 1.4285715, %v170_v52  ;;  %v176_v54 = vrot.slane %v167_v51, %v175_v49 }
 0x128   :  { %v178_v56 = vmul.f32 %v176_v54, %v136_v19  ;;  %v183_v57 = vrot.slane %v171_v53, %v175_v49  ;;  %v293_v19 = vld [vmem:[%s629_s6] sm:$0x1]  ;;  %s481_s6 = smov [#allocation4]  }
 0x129   :  { %s347_s9 = sshll.u32 %s481_s6, 4  ;;  %s348_s9 = int_to_ptr.vmem [resolvable:$true] %s347_s9 }
 0x12a   :  { %v185_v58 = vadd.f32 %v183_v57, %v178_v56  ;;  %s455_s7 = scalar_lea.vmem %s348_s9, 128  ;;  %p460_p1 = scmp.lt.s32.totalorder %s348_s9, %s348_s9 }
 0x12b   :  { %p456_p0 = scmp.ne.s32.totalorder %s348_s9, %s455_s7  ;;  %p461_p2 = scmp.lt.s32.totalorder %s455_s7, %s455_s7 }
 0x12c   :  { %v186_v59 = vmax.f32 %v185_v58, 0.0 }
 0x12d   :  { %p462_p3 = por %p461_p2, %p460_p1 }
 0x12e   :  { %v372_v60 = vpack.c.bf16 %v186_v59, %v186_v59 }
 0x12f   :  { %p463_p4 = pnand %p462_p3, %p456_p0 }
 0x130   :  { %429 = vmatmul.mubr.msk.bf16.vlgmr.msra.gmra.mrb[0].mxu1 %vm371_vm2, %v372_v60 }
 0x203   :  { %v287_v61 = vpop.f32.mrb[0].mxu1 }
 0x204   :  { %v299_v62 = vrot.slane %v287_v61, 4  ;;  %v430_v63 = vpop.f32.mrb[1].mxu1 }
 0x205   :  { %v290_v0 = vpop.f32.mrb[2].mxu1 }
 0x206   :  { %v300_v1 = vadd.f32 %v299_v62, %v287_v61  ;;  %v431_v2 = vpop.f32.mrb[3].mxu1 }
 0x208   :  { %v301_v3 = vrot.slane %v300_v1, 2 }
 0x20a   :  { %v302_v4 = vadd.f32 %v301_v3, %v300_v1 }
 0x20c   :  { %v303_v5 = vrot.slane %v302_v4, 1 }
 0x20e   :  { %v304_v6 = vadd.f32 %v303_v5, %v302_v4 }
 0x210   :  { %v305_v7 = vmul.f32 0.125, %v304_v6 }
 0x212   :  { %v306_v8 = vsub.f32 %v287_v61, %v305_v7  ;;  %v319_v20 = vmul.f32 %v305_v7, %v293_v19 }
 0x214   :  { %v307_v10 = vmul.f32 %v306_v8, %v306_v8 }
 0x216   :  { %v308_v11 = vrot.slane %v307_v10, 4 }
 0x218   :  { %v309_v12 = vadd.f32 %v308_v11, %v307_v10 }
 0x21a   :  { %v310_v13 = vrot.slane %v309_v12, 2 }
 0x21c   :  { %v311_v14 = vadd.f32 %v310_v13, %v309_v12 }
 0x21e   :  { %v312_v15 = vrot.slane %v311_v14, 1 }
 0x220   :  { %v313_v16 = vadd.f32 %v312_v15, %v311_v14 }
 0x222   :  { %v314_v17 = vmul.f32 0.125, %v313_v16 }
 0x224   :  { %v315_v18 = vadd.f32 1e-05, %v314_v17 }
 0x226   :  { %453 = vrsqrt.f32 %v315_v18 }
 0x230   :  { %v454_v22 = vpop.eup %453 }
 0x231   :  { %v317_v24 = vmul.f32 %v454_v22, %v293_v19  ;;  %v320_v25 = vmul.f32 %v454_v22, %v319_v20 }
 0x233   :  { %v318_v27 = vmul.f32 1.4285715, %v317_v24  ;;  %v321_v28 = vsub.f32 %v294_v23, %v320_v25 }
 0x235   :  { %v327_v29 = vrot.slane %v318_v27, %v175_v49  ;;  %v322_v30 = vmul.f32 1.4285715, %v321_v28 }
 0x237   :  { %v329_v32 = vmul.f32 %v327_v29, %v287_v61  ;;  %v334_v33 = vrot.slane %v322_v30, %v175_v49 }
 0x239   :  { %v336_v34 = vadd.f32 %v334_v33, %v329_v32 }
 0x23b   :  { %v337_v35 = vmax.f32 %v336_v34, 0.0 }
 0x23d   :  { %v338_v36 = vsel %vm298_vm3, %v337_v35, 0.0 }
 0x23e   :  { %v339_v37 = vadd.f32 %v338_v36, %v564_v9 }
 0x240   :  { %340 = vst [vmem:[#allocation4] sm:$0xff] %v339_v37 }
 0x241   :  { %466 = shalt.err (!%p463_p4)
}
 0x242   :  { %s467_s12 = scalar_lea.hbm %s633_s10, 128 }
 0x243   :  { %p468_p5 = scmp.ne.s32.totalorder %s633_s10, %s467_s12  ;;  %p471_p6 = scmp.lt.u32.totalorder %s467_s12, %s633_s10 }
 0x245   :  { %p473_p7 = pnand %p471_p6, %p468_p5 }
 0x247   :  { %476 = shalt.err (!%p473_p7)
}
 0x248   :  { %350 = dma.vmem_to_hbm [thread:$0]  %s348_s9, 128, %s633_s10, [#allocation5]  }
 0x249   :  { %477 = dma.done.wait [#allocation5], 128  }
 0x24a   :  { %478 = vsyncadd [#allocation5], 4294967168 }
 0x24b   :  { %354 = vsyncpa [#allocation5], 1 }

</bundles_post_ra>
